<compile_context>
chip_gen: v5e
topology: v5e:2x2
jax: 0.10.0
libtpu: 0.0.40
codegen_flags: <defaults>
</compile_context>

<pallas_src>
import functools

import jax
import jax.numpy as jnp
from jax.experimental import pallas as pl
from jax.experimental.pallas import tpu as pltpu

INPUT_SIZE = 784
HIDDEN_SIZE = 32
NUM_CLASSES = 10

# Batch tile big enough to amortize per-step overhead; footprint at tb=4096 with f32 x
# (double-buffered, 896-lane padded) + f32 out tiles + resident weights is ~33 MiB.
DEFAULT_TB = 4096


def mlp_kernel(x_ref, w1_ref, b1_ref, w2_ref, b2_ref, o_ref):
    # x_ref: (TB, 784) f32   w1_ref: (784, H) bf16   b1_ref: (1, H) f32
    # w2_ref: (H, C) bf16    b2_ref: (1, C) f32      o_ref: (TB, C) f32
    # Cast x -> bf16 in-kernel (VPU work hidden under the x DMA); f32 accumulation.
    x = x_ref[...].astype(jnp.bfloat16)
    h = jnp.dot(x, w1_ref[...], preferred_element_type=jnp.float32)       # (TB, H) f32
    h = jnp.maximum(h + b1_ref[...], 0.0)                                 # ReLU
    out = jnp.dot(h.astype(jnp.bfloat16), w2_ref[...],
                  preferred_element_type=jnp.float32)                     # (TB, C) f32
    o_ref[...] = (out + b2_ref[...]).astype(o_ref.dtype)


def _pick_tb(batch, tb_req):
    # Keep >=2 grid steps per TensorCore (v7x has 2 TCs) so megacore sharding and the
    # double-buffered DMA pipeline both engage: cap tile at ceil(B/4), floor to a
    # multiple of 8 (sublane granularity), never below 8 and never above B.
    tb = min(tb_req, pl.cdiv(batch, 4))
    tb = max(8, (tb // 8) * 8)
    return min(tb, batch)


@functools.partial(jax.jit, static_argnames=("tb",))
def _forward(x, w1_bf, b1, w2_bf, b2, *, tb):
    B = x.shape[0]
    grid = (pl.cdiv(B, tb),)

    return pl.pallas_call(
        mlp_kernel,
        out_shape=jax.ShapeDtypeStruct((B, NUM_CLASSES), jnp.float32),
        grid_spec=pltpu.PrefetchScalarGridSpec(
            num_scalar_prefetch=0,
            grid=grid,
            in_specs=[
                # x: streamed per batch tile in native f32 (no wrapper cast pass).
                pl.BlockSpec((tb, INPUT_SIZE), lambda i: (i, 0)),
                # Weights / biases: constant block index -> DMA'd once, VMEM-resident.
                pl.BlockSpec((INPUT_SIZE, HIDDEN_SIZE), lambda i: (0, 0)),
                pl.BlockSpec((1, HIDDEN_SIZE), lambda i: (0, 0)),
                pl.BlockSpec((HIDDEN_SIZE, NUM_CLASSES), lambda i: (0, 0)),
                pl.BlockSpec((1, NUM_CLASSES), lambda i: (0, 0)),
            ],
            out_specs=pl.BlockSpec((tb, NUM_CLASSES), lambda i: (i, 0)),
        ),
        compiler_params=pltpu.CompilerParams(
            dimension_semantics=("parallel",),      # megacore sharding of batch on v7x
            vmem_limit_bytes=48 * 1024 * 1024,      # ~33 MiB actual need; headroom on v7x
        ),
    )(x, w1_bf, b1, w2_bf, b2)


def neural_net_forward(x, params, *, tb=DEFAULT_TB):
    """params = (w1_bf16, b1_f32, w2_bf16, b2_f32), weights stored (in, out)."""
    w1_bf, b1, w2_bf, b2 = params
    tb = _pick_tb(x.shape[0], tb)
    return _forward(x, w1_bf, b1, w2_bf, b2, tb=tb)


def init_linear(key, fan_in, fan_out):
    # Mimic PyTorch nn.Linear default init: U(-1/sqrt(fan_in), 1/sqrt(fan_in)).
    # Weight returned transposed vs PyTorch: (in_features, out_features).
    kw, kb = jax.random.split(key)
    bound = 1.0 / jnp.sqrt(fan_in)
    w = jax.random.uniform(kw, (fan_in, fan_out), jnp.float32, -bound, bound)
    b = jax.random.uniform(kb, (1, fan_out), jnp.float32, -bound, bound)
    return w, b


def prepare_params(w1, b1, w2, b2):
    # One-time bf16 weight cast, hoisted out of the per-call jitted forward.
    return (w1.astype(jnp.bfloat16), b1, w2.astype(jnp.bfloat16), b2)


if __name__ == "__main__":
    key = jax.random.PRNGKey(0)
    kx, k1, k2 = jax.random.split(key, 3)

    batch = 256  # small test shape; _pick_tb gives tb=64 -> a 4-step pipelined grid
    x = jax.random.normal(kx, (batch, INPUT_SIZE), jnp.float32)

    w1, b1 = init_linear(k1, INPUT_SIZE, HIDDEN_SIZE)
    w2, b2 = init_linear(k2, HIDDEN_SIZE, NUM_CLASSES)
    params = prepare_params(w1, b1, w2, b2)

    out = neural_net_forward(x, params)
    out = jax.block_until_ready(out)
    assert out.shape == (batch, NUM_CLASSES)

    # Reference 1: same bf16-cast / f32-accumulate recipe as the kernel (tight check).
    xb = x.astype(jnp.bfloat16)
    ref = jnp.dot(xb, w1.astype(jnp.bfloat16), preferred_element_type=jnp.float32) + b1
    ref = jnp.maximum(ref, 0.0)
    ref = jnp.dot(ref.astype(jnp.bfloat16), w2.astype(jnp.bfloat16),
                  preferred_element_type=jnp.float32) + b2
    assert jnp.allclose(out, ref, atol=2e-3, rtol=2e-3), "mismatch vs bf16-consistent ref"

    # Reference 2: full-f32 PyTorch-equivalent forward (loose check, bf16 quantization).
    ref32 = jnp.maximum(x @ w1 + b1, 0.0) @ w2 + b2
    assert jnp.allclose(out, ref32, atol=5e-2, rtol=5e-2), "mismatch vs f32 ref"

    print("KERNEL_OK")
</pallas_src>

<mosaic_0001>
module attributes {stable_mosaic.version = 11 : i64} {
  func.func @mlp_kernel(%arg0: i32, %arg1: memref<64x784xf32, #tpu.memory_space<vmem>>, %arg2: memref<784x32xbf16, #tpu.memory_space<vmem>>, %arg3: memref<1x32xf32, #tpu.memory_space<vmem>>, %arg4: memref<32x10xbf16, #tpu.memory_space<vmem>>, %arg5: memref<1x10xf32, #tpu.memory_space<vmem>>, %arg6: memref<64x10xf32, #tpu.memory_space<vmem>>) attributes {dimension_semantics = [#tpu.dimension_semantics<parallel>], iteration_bounds = array<i64: 4>, scalar_prefetch = 0 : i64, scratch_operands = 0 : i64, tpu.core_type = #tpu.core_type<tc>, window_params = [{transform_indices = @transform_0, window_bounds = array<i64: 64, 784>}, {pipeline_mode = #tpu.pipeline_mode<synchronous>, transform_indices = @transform_1, window_bounds = array<i64: 784, 32>}, {pipeline_mode = #tpu.pipeline_mode<synchronous>, transform_indices = @transform_2, window_bounds = array<i64: 1, 32>}, {pipeline_mode = #tpu.pipeline_mode<synchronous>, transform_indices = @transform_3, window_bounds = array<i64: 32, 10>}, {pipeline_mode = #tpu.pipeline_mode<synchronous>, transform_indices = @transform_4, window_bounds = array<i64: 1, 10>}, {transform_indices = @transform_5, window_bounds = array<i64: 64, 10>}]} {
    %c0 = arith.constant 0 : index
    %c0_0 = arith.constant 0 : index
    %0 = vector.load %arg1[%c0, %c0_0] : memref<64x784xf32, #tpu.memory_space<vmem>>, vector<64x784xf32>
    %1 = arith.truncf %0 : vector<64x784xf32> to vector<64x784xbf16>
    %c0_1 = arith.constant 0 : index
    %c0_2 = arith.constant 0 : index
    %2 = vector.load %arg2[%c0_1, %c0_2] : memref<784x32xbf16, #tpu.memory_space<vmem>>, vector<784x32xbf16>
    %cst = arith.constant dense<0.000000e+00> : vector<64x32xf32>
    %3 = tpu.matmul %1, %2, %cst {dimension_numbers = #tpu.dot_dimension_numbers<[1], [0], [0], [1], [0, 0, 1, 1], [], []>} : vector<64x784xbf16>, vector<784x32xbf16>, vector<64x32xf32> -> vector<64x32xf32>
    %c0_3 = arith.constant 0 : index
    %c0_4 = arith.constant 0 : index
    %4 = vector.load %arg3[%c0_3, %c0_4] : memref<1x32xf32, #tpu.memory_space<vmem>>, vector<1x32xf32>
    %5 = vector.broadcast %4 : vector<1x32xf32> to vector<64x32xf32>
    %6 = arith.addf %3, %5 : vector<64x32xf32>
    %cst_5 = arith.constant 0.000000e+00 : f32
    %7 = vector.broadcast %cst_5 : f32 to vector<64x32xf32>
    %8 = arith.maximumf %6, %7 : vector<64x32xf32>
    %9 = arith.truncf %8 : vector<64x32xf32> to vector<64x32xbf16>
    %c0_6 = arith.constant 0 : index
    %c0_7 = arith.constant 0 : index
    %10 = vector.load %arg4[%c0_6, %c0_7] : memref<32x10xbf16, #tpu.memory_space<vmem>>, vector<32x10xbf16>
    %cst_8 = arith.constant dense<0.000000e+00> : vector<64x10xf32>
    %11 = tpu.matmul %9, %10, %cst_8 {dimension_numbers = #tpu.dot_dimension_numbers<[1], [0], [0], [1], [0, 0, 1, 1], [], []>} : vector<64x32xbf16>, vector<32x10xbf16>, vector<64x10xf32> -> vector<64x10xf32>
    %c0_9 = arith.constant 0 : index
    %c0_10 = arith.constant 0 : index
    %12 = vector.load %arg5[%c0_9, %c0_10] : memref<1x10xf32, #tpu.memory_space<vmem>>, vector<1x10xf32>
    %13 = vector.broadcast %12 : vector<1x10xf32> to vector<64x10xf32>
    %14 = arith.addf %11, %13 : vector<64x10xf32>
    %c0_11 = arith.constant 0 : index
    %c0_12 = arith.constant 0 : index
    %15 = vector.load %arg6[%c0_11, %c0_12] : memref<64x10xf32, #tpu.memory_space<vmem>>, vector<64x10xf32>
    tpu.vector_store %arg6[%c0_11, %c0_12], %14 {strides = array<i32>} : memref<64x10xf32, #tpu.memory_space<vmem>>, vector<64x10xf32>,
    return
  }
  func.func @transform_0(%arg0: i32) -> (i32, i32) {
    %c0_i32 = arith.constant 0 : i32
    %c0_i32_0 = arith.constant 0 : i32
    return %arg0, %c0_i32 : i32, i32
  }
  func.func @transform_1(%arg0: i32) -> (i32, i32) {
    %c0_i32 = arith.constant 0 : i32
    %c0_i32_0 = arith.constant 0 : i32
    %c0_i32_1 = arith.constant 0 : i32
    return %c0_i32, %c0_i32_0 : i32, i32
  }
  func.func @transform_2(%arg0: i32) -> (i32, i32) {
    %c0_i32 = arith.constant 0 : i32
    %c0_i32_0 = arith.constant 0 : i32
    %c0_i32_1 = arith.constant 0 : i32
    return %c0_i32, %c0_i32_0 : i32, i32
  }
  func.func @transform_3(%arg0: i32) -> (i32, i32) {
    %c0_i32 = arith.constant 0 : i32
    %c0_i32_0 = arith.constant 0 : i32
    %c0_i32_1 = arith.constant 0 : i32
    return %c0_i32, %c0_i32_0 : i32, i32
  }
  func.func @transform_4(%arg0: i32) -> (i32, i32) {
    %c0_i32 = arith.constant 0 : i32
    %c0_i32_0 = arith.constant 0 : i32
    %c0_i32_1 = arith.constant 0 : i32
    return %c0_i32, %c0_i32_0 : i32, i32
  }
  func.func @transform_5(%arg0: i32) -> (i32, i32) {
    %c0_i32 = arith.constant 0 : i32
    %c0_i32_0 = arith.constant 0 : i32
    return %arg0, %c0_i32 : i32, i32
  }
}

</mosaic_0001>

<bundles_post_ra>
// kernel: _forward.1
= control target key start
LH: loop header
LB: loop body
LE: loop exit
PB: predicated region body
PF: predicated region fallthrough
CT: control target
= control target key end

     0   :  { %s1390_s18 = smov 0   ;;  %s1669_s0 = inlined_call_operand.vmem [shape: f32[256,784], index: 0, kind: input, shape index: {}]   ;;  %s1670_s1 = inlined_call_operand.vmem [shape: bf16[784,32], index: 1, kind: input, shape index: {}]   ;;  %s1671_s2 = inlined_call_operand.vmem [shape: f32[1,32], index: 2, kind: input, shape index: {}]   ;;  %s1672_s3 = inlined_call_operand.vmem [shape: bf16[32,10], index: 3, kind: input, shape index: {}]   ;;  %s1673_s4 = inlined_call_operand.vmem [shape: f32[1,10], index: 4, kind: input, shape index: {}]   ;;  %s1674_s5 = inlined_call_operand.vmem [shape: f32[256,10], index: 5, kind: output, shape index: {}]  }
   0x1 LB: > { %s1067_s19 = sadd.s32 4294967295, %s1358_s18   ;;  %p1071_p0 = scmp.ge.s32.totalorder %s1358_s18, 1  ;;  %s1358_s18 = sphi %s1390_s18, %s15_s18  }
   0x2   : > { %p189_p1 = scmp.lt.s32.totalorder %s1358_s18, 5 }
   0x4   : > { %p190_p2 = pnand %p1071_p0, %p189_p1 }
   0x5   : > { %s1072_s21 = sshll.u32 (!%p190_p2), %s1067_s19, 3 }
   0x6   : > { %193 = sbr.rel (%p190_p2) target bundleno = 446 (0x1be), region = 40  ;;  %p219_p3 = scmp.lt.s32.totalorder (!%p190_p2), %s1072_s21, 31 }
   0xb   : > { %v1297_v0 = vld [vmem:[%s1670_s1 + $0x38] sm:$0xff]  ;;  %v1296_v4 = vld [vmem:[%s1670_s1 + $0x30] sm:$0xff]  ;;  %v1295_v8 = vld [vmem:[%s1670_s1 + $0x28] sm:$0xff]  ;;  %s1676_s21 = smov (!%p219_p3, %s1072_s21), 31  ;;  %vm712_vm0 = vcmask 130048   ;;  %vm960_vm1 = vcmask 261120  }
   0xc   : > { %v1305_v1 = vld [vmem:[%s1670_s1 + $0x78] sm:$0xff]  ;;  %725 = vmatpush.bf16.msra.mxu0 %v1297_v0  ;;  %v1304_v5 = vld [vmem:[%s1670_s1 + $0x70] sm:$0xff]  ;;  %v1303_v9 = vld [vmem:[%s1670_s1 + $0x68] sm:$0xff]  ;;  %s1341_s16 = smul.u32 56, %s1676_s21  ;;  %s1075_s12 = sshll.u32 %s1676_s21, 3  ;;  %vm1002_vm2 = vcmask 80896  }
   0xd   : > { %v1313_v2 = vld [vmem:[%s1670_s1 + $0xb8] sm:$0xff]  ;;  %754 = vmatpush.bf16.msra.mxu1 %v1305_v1  ;;  %v1312_v6 = vld [vmem:[%s1670_s1 + $0xb0] sm:$0xff]  ;;  %v1311_v10 = vld [vmem:[%s1670_s1 + $0xa8] sm:$0xff]  ;;  %s229_s17 = scalar_lea.vmem %s1674_s5, %s1075_s12 }
   0xe   : > { %v1321_v3 = vld [vmem:[%s1670_s1 + $0xf8] sm:$0xff]  ;;  %783 = vmatpush.bf16.msra.mxu2 %v1313_v2  ;;  %v1320_v7 = vld [vmem:[%s1670_s1 + $0xf0] sm:$0xff]  ;;  %v1319_v11 = vld [vmem:[%s1670_s1 + $0xe8] sm:$0xff]  ;;  %s1482_s19 = scalar_lea.vmem %s1669_s0, %s1341_s16 }
   0xf   : > { %812 = vmatpush.bf16.msra.mxu3 %v1321_v3  ;;  %v1294_v12 = vld [vmem:[%s1670_s1 + $0x20] sm:$0xff]  ;;  %v1293_v16 = vld [vmem:[%s1670_s1 + $0x18] sm:$0xff]  ;;  %v1292_v20 = vld [vmem:[%s1670_s1 + $0x10] sm:$0xff] }
  0x10   : > { %726 = vmatpush.bf16.msra.mxu0 %v1296_v4  ;;  %v1302_v13 = vld [vmem:[%s1670_s1 + $0x60] sm:$0xff]  ;;  %v1301_v17 = vld [vmem:[%s1670_s1 + $0x58] sm:$0xff]  ;;  %v1300_v21 = vld [vmem:[%s1670_s1 + $0x50] sm:$0xff] }
  0x11   : > { %755 = vmatpush.bf16.msra.mxu1 %v1304_v5  ;;  %v1310_v14 = vld [vmem:[%s1670_s1 + $0xa0] sm:$0xff]  ;;  %v1309_v18 = vld [vmem:[%s1670_s1 + $0x98] sm:$0xff]  ;;  %v1308_v22 = vld [vmem:[%s1670_s1 + $0x90] sm:$0xff] }
  0x12   : > { %784 = vmatpush.bf16.msra.mxu2 %v1312_v6  ;;  %v1318_v15 = vld [vmem:[%s1670_s1 + $0xe0] sm:$0xff]  ;;  %v1317_v19 = vld [vmem:[%s1670_s1 + $0xd8] sm:$0xff]  ;;  %v1316_v23 = vld [vmem:[%s1670_s1 + $0xd0] sm:$0xff] }
  0x13   : > { %813 = vmatpush.bf16.msra.mxu3 %v1320_v7  ;;  %v1291_v24 = vld [vmem:[%s1670_s1 + $0x8] sm:$0xff]  ;;  %v1290_v28 = vld [vmem:[%s1670_s1] sm:$0xff]  ;;  %v239_v33 = vld [vmem:[%s1482_s19 + $0x38] sm:$0xff] }
  0x14   : > { %727 = vmatpush.bf16.msra.mxu0 %v1295_v8  ;;  %v1299_v25 = vld [vmem:[%s1670_s1 + $0x48] sm:$0xff]  ;;  %v1298_v29 = vld [vmem:[%s1670_s1 + $0x40] sm:$0xff]  ;;  %v234_v36 = vld [vmem:[%s1482_s19 + $0x10] sm:$0xff] }
  0x15   : > { %756 = vmatpush.bf16.msra.mxu1 %v1303_v9  ;;  %v1307_v26 = vld [vmem:[%s1670_s1 + $0x88] sm:$0xff]  ;;  %v1306_v30 = vld [vmem:[%s1670_s1 + $0x80] sm:$0xff]  ;;  %v235_v38 = vld [vmem:[%s1482_s19 + $0x18] sm:$0xff] }
  0x16   : > { %785 = vmatpush.bf16.msra.mxu2 %v1311_v10  ;;  %v1315_v27 = vld [vmem:[%s1670_s1 + $0xc8] sm:$0xff]  ;;  %v1314_v31 = vld [vmem:[%s1670_s1 + $0xc0] sm:$0xff]  ;;  %v242_v39 = vld [vmem:[%s1482_s19 + $0x50] sm:$0xff] }
  0x17   : > { %814 = vmatpush.bf16.msra.mxu3 %v1319_v11  ;;  %v232_v32 = vld [vmem:[%s1482_s19] sm:$0xff]  ;;  %v233_v34 = vld [vmem:[%s1482_s19 + $0x8] sm:$0xff]  ;;  %v1329_v41 = vld [vmem:[%s1670_s1 + $0x138] sm:$0xff]  ;;  %v291_v45 = vpack.c.bf16 %v242_v39, %v235_v38 }
  0x18   : > { %728 = vmatpush.bf16.msra.mxu0 %v1294_v12  ;;  %v240_v35 = vld [vmem:[%s1482_s19 + $0x40] sm:$0xff]  ;;  %v241_v37 = vld [vmem:[%s1482_s19 + $0x48] sm:$0xff]  ;;  %v288_v42 = vpack.c.bf16 %v239_v33, %v232_v32  ;;  %v1337_v46 = vld [vmem:[%s1670_s1 + $0x178] sm:$0xff] }
  0x19   : > { %757 = vmatpush.bf16.msra.mxu1 %v1302_v13  ;;  %v1338_v40 = vld [vmem:[%s1670_s1 + $0x180] sm:$0xff]  ;;  %v289_v43 = vpack.c.bf16 %v240_v35, %v233_v34  ;;  %v290_v44 = vpack.c.bf16 %v241_v37, %v234_v36  ;;  %v1328_v47 = vld [vmem:[%s1670_s1 + $0x130] sm:$0xff]  ;;  %v1327_v49 = vld [vmem:[%s1670_s1 + $0x128] sm:$0xff] }
  0x1a   : > { %786 = vmatpush.bf16.msra.mxu2 %v1310_v14  ;;  %v1336_v48 = vld [vmem:[%s1670_s1 + $0x170] sm:$0xff]  ;;  %v1335_v50 = vld [vmem:[%s1670_s1 + $0x168] sm:$0xff]  ;;  %v1326_v51 = vld [vmem:[%s1670_s1 + $0x120] sm:$0xff] }
  0x1b   : > { %815 = vmatpush.bf16.msra.mxu3 %v1318_v15  ;;  %v246_v52 = vld [vmem:[%s1482_s19 + $0x70] sm:$0xff]  ;;  %v253_v53 = vld [vmem:[%s1482_s19 + $0xa8] sm:$0xff]  ;;  %v247_v54 = vld [vmem:[%s1482_s19 + $0x78] sm:$0xff] }
  0x1c   : > { %729 = vmatpush.bf16.msra.mxu0 %v1293_v16  ;;  %v254_v55 = vld [vmem:[%s1482_s19 + $0xb0] sm:$0xff]  ;;  %v248_v56 = vld [vmem:[%s1482_s19 + $0x80] sm:$0xff]  ;;  %v255_v57 = vld [vmem:[%s1482_s19 + $0xb8] sm:$0xff]  ;;  %v295_v62 = vpack.c.bf16 %v253_v53, %v246_v52 }
  0x1d   : > { %758 = vmatpush.bf16.msra.mxu1 %v1301_v17  ;;  %v249_v58 = vld [vmem:[%s1482_s19 + $0x88] sm:$0xff]  ;;  %v256_v59 = vld [vmem:[%s1482_s19 + $0xc0] sm:$0xff]  ;;  %v1325_v61 = vld [vmem:[%s1670_s1 + $0x118] sm:$0xff]  ;;  %v296_v63 = vpack.c.bf16 %v254_v55, %v247_v54  ;;  %v297_v0 = vpack.c.bf16 %v255_v57, %v248_v56 }
  0x1e   : > { %787 = vmatpush.bf16.msra.mxu2 %v1309_v18  ;;  %v1334_v60 = vld [vmem:[%s1670_s1 + $0x160] sm:$0xff]  ;;  %v298_v1 = vpack.c.bf16 %v256_v59, %v249_v58  ;;  %v1333_v2 = vld [vmem:[%s1670_s1 + $0x158] sm:$0xff]  ;;  %v1324_v3 = vld [vmem:[%s1670_s1 + $0x110] sm:$0xff] }
  0x1f   : > { %816 = vmatpush.bf16.msra.mxu3 %v1317_v19  ;;  %v1332_v4 = vld [vmem:[%s1670_s1 + $0x150] sm:$0xff]  ;;  %v1323_v5 = vld [vmem:[%s1670_s1 + $0x108] sm:$0xff]  ;;  %v1322_v7 = vld [vmem:[%s1670_s1 + $0x100] sm:$0xff] }
  0x20   : > { %730 = vmatpush.bf16.msra.mxu0 %v1292_v20  ;;  %v1331_v6 = vld [vmem:[%s1670_s1 + $0x148] sm:$0xff]  ;;  %v260_v8 = vld [vmem:[%s1482_s19 + $0xe0] sm:$0xff]  ;;  %v267_v9 = vld [vmem:[%s1482_s19 + $0x118] sm:$0xff] }
  0x21   : > { %759 = vmatpush.bf16.msra.mxu1 %v1300_v21  ;;  %v261_v10 = vld [vmem:[%s1482_s19 + $0xe8] sm:$0xff]  ;;  %v268_v11 = vld [vmem:[%s1482_s19 + $0x120] sm:$0xff]  ;;  %v262_v12 = vld [vmem:[%s1482_s19 + $0xf0] sm:$0xff]  ;;  %v302_v17 = vpack.c.bf16 %v267_v9, %v260_v8 }
  0x22   : > { %788 = vmatpush.bf16.msra.mxu2 %v1308_v22  ;;  %v269_v13 = vld [vmem:[%s1482_s19 + $0x128] sm:$0xff]  ;;  %v263_v14 = vld [vmem:[%s1482_s19 + $0xf8] sm:$0xff]  ;;  %v270_v15 = vld [vmem:[%s1482_s19 + $0x130] sm:$0xff]  ;;  %v303_v18 = vpack.c.bf16 %v268_v11, %v261_v10 }
  0x23   : > { %817 = vmatpush.bf16.msra.mxu3 %v1316_v23  ;;  %v1330_v16 = vld [vmem:[%s1670_s1 + $0x140] sm:$0xff]  ;;  %v304_v19 = vpack.c.bf16 %v269_v13, %v262_v12  ;;  %v305_v20 = vpack.c.bf16 %v270_v15, %v263_v14  ;;  %v274_v21 = vld [vmem:[%s1482_s19 + $0x150] sm:$0xff]  ;;  %v281_v22 = vld [vmem:[%s1482_s19 + $0x188] sm:$0xff] }
  0x24   : > { %731 = vmatpush.bf16.msra.mxu0 %v1291_v24  ;;  %v275_v23 = vld [vmem:[%s1482_s19 + $0x158] sm:$0xff]  ;;  %v282_v24 = vld [vmem:[%s1482_s19 + $0x190] sm:$0xff]  ;;  %v236_v33 = vld [vmem:[%s1482_s19 + $0x20] sm:$0xff] }
  0x25   : > { %760 = vmatpush.bf16.msra.mxu1 %v1299_v25  ;;  %v276_v25 = vld [vmem:[%s1482_s19 + $0x160] sm:$0xff]  ;;  %v243_v34 = vld [vmem:[%s1482_s19 + $0x58] sm:$0xff]  ;;  %v237_v35 = vld [vmem:[%s1482_s19 + $0x28] sm:$0xff] }
  0x26   : > { %789 = vmatpush.bf16.msra.mxu2 %v1307_v26  ;;  %v283_v26 = vld [vmem:[%s1482_s19 + $0x198] sm:$0xff]  ;;  %v244_v36 = vld [vmem:[%s1482_s19 + $0x60] sm:$0xff]  ;;  %v238_v37 = vld [vmem:[%s1482_s19 + $0x30] sm:$0xff]  ;;  %v292_v39 = vpack.c.bf16 %v243_v34, %v236_v33 }
  0x27   : > { %818 = vmatpush.bf16.msra.mxu3 %v1315_v27  ;;  %v277_v27 = vld [vmem:[%s1482_s19 + $0x168] sm:$0xff]  ;;  %v271_v52 = vld [vmem:[%s1482_s19 + $0x138] sm:$0xff]  ;;  %v272_v54 = vld [vmem:[%s1482_s19 + $0x140] sm:$0xff] }
  0x28   : > { %732 = vmatpush.bf16.msra.mxu0 %v1290_v28  ;;  %v284_v28 = vld [vmem:[%s1482_s19 + $0x1a0] sm:$0xff]  ;;  %v245_v38 = vld [vmem:[%s1482_s19 + $0x68] sm:$0xff]  ;;  %v266_v55 = vld [vmem:[%s1482_s19 + $0x110] sm:$0xff] }
  0x29   : > { %761 = vmatpush.bf16.msra.mxu1 %v1298_v29  ;;  %v309_v29 = vpack.c.bf16 %v281_v22, %v274_v21  ;;  %v312_v32 = vpack.c.bf16 %v284_v28, %v277_v27  ;;  %v265_v53 = vld [vmem:[%s1482_s19 + $0x108] sm:$0xff] }
  0x2a   : > { %790 = vmatpush.bf16.msra.mxu2 %v1306_v30  ;;  %v310_v30 = vpack.c.bf16 %v282_v24, %v275_v23  ;;  %v273_v56 = vld [vmem:[%s1482_s19 + $0x148] sm:$0xff]  ;;  %v307_v58 = vpack.c.bf16 %v272_v54, %v265_v53 }
  0x2b   : > { %819 = vmatpush.bf16.msra.mxu3 %v1314_v31  ;;  %733 = vmatmul.bf16.vlgmr.msra.gmra.mxu0 %v288_v42  ;;  %v311_v31 = vpack.c.bf16 %v283_v26, %v276_v25  ;;  %v250_v42 = vld [vmem:[%s1482_s19 + $0x90] sm:$0xff]  ;;  %v308_v59 = vpack.c.bf16 %v273_v56, %v266_v55 }
  0x2c   : > { %841 = vmatpush.bf16.msrb.mxu0 %v1329_v41  ;;  %762 = vmatmul.bf16.vlgmr.msra.gmra.mxu1 %v289_v43  ;;  %v294_v41 = vpack.c.bf16 %v245_v38, %v238_v37  ;;  %v257_v43 = vld [vmem:[%s1482_s19 + $0xc8] sm:$0xff] }
  0x2d   : > { %791 = vmatmul.bf16.vlgmr.msra.gmra.mxu2 %v290_v44  ;;  %870 = vmatpush.bf16.msrb.mxu1 %v1337_v46  ;;  %v251_v44 = vld [vmem:[%s1482_s19 + $0x98] sm:$0xff]  ;;  %v252_v46 = vld [vmem:[%s1482_s19 + $0xa0] sm:$0xff] }
  0x2e   : > { %906 = vmatpush.bf16.msrb.mxu2 %v1338_v40  ;;  %820 = vmatmul.bf16.vlgmr.msra.gmra.mxu3 %v291_v45  ;;  %v293_v40 = vpack.c.bf16 %v244_v36, %v237_v35  ;;  %v258_v45 = vld [vmem:[%s1482_s19 + $0xd0] sm:$0xff] }
  0x30   : > { %842 = vmatpush.bf16.msrb.mxu0 %v1328_v47  ;;  %v259_v47 = vld [vmem:[%s1482_s19 + $0xd8] sm:$0xff] }
  0x31   : > { %871 = vmatpush.bf16.msrb.mxu1 %v1336_v48  ;;  %v299_v48 = vpack.c.bf16 %v257_v43, %v250_v42 }
  0x34   : > { %843 = vmatpush.bf16.msrb.mxu0 %v1327_v49  ;;  %v300_v49 = vpack.c.bf16 %v258_v45, %v251_v44 }
  0x35   : > { %872 = vmatpush.bf16.msrb.mxu1 %v1335_v50  ;;  %v301_v50 = vpack.c.bf16 %v259_v47, %v252_v46 }
  0x38   : > { %844 = vmatpush.bf16.msrb.mxu0 %v1326_v51  ;;  %v264_v51 = vld [vmem:[%s1482_s19 + $0x100] sm:$0xff] }
  0x39   : > { %873 = vmatpush.bf16.msrb.mxu1 %v1334_v60  ;;  %v306_v57 = vpack.c.bf16 %v271_v52, %v264_v51  ;;  %v278_v60 = vld [vmem:[%s1482_s19 + $0x170] sm:$0xff] }
  0x3b   : > { %738 = vmatmul.bf16.gmra.mxu0 %v295_v62  ;;  %v279_v62 = vld [vmem:[%s1482_s19 + $0x178] sm:$0xff] }
  0x3c   : > { %845 = vmatpush.bf16.msrb.mxu0 %v1325_v61  ;;  %767 = vmatmul.bf16.gmra.mxu1 %v296_v63  ;;  %v285_v61 = vld [vmem:[%s1482_s19 + $0x1a8] sm:$0xff]  ;;  %v286_v63 = vld [vmem:[%s1482_s19 + $0x1b0] sm:$0xff] }
  0x3d   : > { %796 = vmatmul.bf16.gmra.mxu2 %v297_v0  ;;  %874 = vmatpush.bf16.msrb.mxu1 %v1333_v2  ;;  %v280_v0 = vld [vmem:[%s1482_s19 + $0x180] sm:$0xff]  ;;  %v313_v2 = vpack.c.bf16 %v285_v61, %v278_v60 }
  0x3e   : > { %825 = vmatmul.bf16.gmra.mxu3 %v298_v1  ;;  %v287_v1 = vld [vmem:[%s1482_s19 + $0x1b8] sm:$0xff] }
  0x40   : > { %846 = vmatpush.bf16.msrb.mxu0 %v1324_v3  ;;  %v314_v3 = vpack.c.bf16 %v286_v63, %v279_v62 }
  0x41   : > { %875 = vmatpush.bf16.msrb.mxu1 %v1332_v4  ;;  %v315_v4 = vpack.c.bf16 %v287_v1, %v280_v0 }
  0x44   : > { %847 = vmatpush.bf16.msrb.mxu0 %v1323_v5  ;;  %v1340_v5 = vld [vmem:[%s1672_s3 + $0x8] sm:$0xff] }
  0x45   : > { %876 = vmatpush.bf16.msrb.mxu1 %v1331_v6  ;;  %979 = vmatpush.bf16.msrb.mxu3 %v1340_v5  ;;  %v1619_v6 = vld [vmem:[%s1671_s2] ss:$0 sm:$0xff] }
  0x48   : > { %848 = vmatpush.bf16.msrb.mxu0 %v1322_v7 }
  0x49   : > { %877 = vmatpush.bf16.msrb.mxu1 %v1330_v16 }
  0x4b   : > { %743 = vmatmul.bf16.gmra.mxu0 %v302_v17 }
  0x4c   : > { %772 = vmatmul.bf16.gmra.mxu1 %v303_v18 }
  0x4d   : > { %801 = vmatmul.bf16.gmra.mxu2 %v304_v19 }
  0x4e   : > { %830 = vmatmul.bf16.gmra.mxu3 %v305_v20  ;;  %v1339_v20 = vld [vmem:[%s1672_s3] sm:$0xff] }
  0x4f   : > { %980 = vmatpush.bf16.msrb.mxu3 %v1339_v20 }
  0x5b   : > { %748 = vmatmul.bf16.gmra.mxu0 %v309_v29 }
  0x5c   : > { %777 = vmatmul.bf16.gmra.mxu1 %v310_v30 }
  0x5d   : > { %806 = vmatmul.bf16.gmra.mxu2 %v311_v31 }
  0x5e   : > { %835 = vmatmul.bf16.gmra.mxu3 %v312_v32 }
  0x6b   : > { %849 = vmatmul.bf16.vlgmr.msrb.gmra.mxu0 %v292_v39 }
  0x6c   : > { %878 = vmatmul.bf16.vlgmr.msrb.gmra.mxu1 %v293_v40 }
  0x6d   : > { %1272 = vmatmul.msk.bf16.vlgmr.msrb.gmra.mxu2 %vm712_vm0, %v294_v41 }
  0x7b   : > { %854 = vmatmul.bf16.gmra.mxu0 %v299_v48 }
  0x7c   : > { %883 = vmatmul.bf16.gmra.mxu1 %v300_v49 }
  0x7d   : > { %1273 = vmatmul.msk.bf16.gmra.mxu2 %vm712_vm0, %v301_v50 }
  0x8b   : > { %859 = vmatmul.bf16.gmra.mxu0 %v306_v57 }
  0x8c   : > { %888 = vmatmul.bf16.gmra.mxu1 %v307_v58 }
  0x8d   : > { %1274 = vmatmul.msk.bf16.gmra.mxu2 %vm712_vm0, %v308_v59 }
  0x9b   : > { %864 = vmatmul.bf16.gmra.mxu0 %v313_v2 }
  0x9c   : > { %893 = vmatmul.bf16.gmra.mxu1 %v314_v3 }
  0x9d   : > { %1275 = vmatmul.msk.bf16.gmra.mxu2 %vm712_vm0, %v315_v4 }
  0xa8   : > { %v734_v7 = vpop.f32.mrf.mxu0 }
  0xa9   : > { %v763_v8 = vpop.f32.mrf.mxu1  ;;  %v735_v9 = vadd.f32 %v1619_v6, %v734_v7 }
  0xab   : > { %v764_v10 = vadd.f32 %v763_v8, %v735_v9 }
  0xb0   : > { %v792_v11 = vpop.f32.mrf.mxu2  ;;  %v736_v13 = vpop.f32.mrf.mxu0 }
  0xb1   : > { %v793_v12 = vadd.f32 %v792_v11, %v764_v10  ;;  %v765_v14 = vpop.f32.mrf.mxu1  ;;  %v821_v34 = vpop.f32.mrf.mxu3  ;;  %v737_v45 = vadd.f32 %v1619_v6, %v736_v13 }
  0xb3   : > { %v766_v49 = vadd.f32 %v765_v14, %v737_v45  ;;  %v822_v52 = vadd.f32 %v821_v34, %v793_v12 }
  0xb8   : > { %v794_v15 = vpop.f32.mrf.mxu2  ;;  %v739_v16 = vpop.f32.mrf.mxu0 }
  0xb9   : > { %v768_v17 = vpop.f32.mrf.mxu1  ;;  %v740_v18 = vadd.f32 %v1619_v6, %v739_v16  ;;  %v823_v44 = vpop.f32.mrf.mxu3  ;;  %v795_v51 = vadd.f32 %v794_v15, %v766_v49 }
  0xbb   : > { %v769_v19 = vadd.f32 %v768_v17, %v740_v18  ;;  %v824_v54 = vadd.f32 %v823_v44, %v795_v51 }
  0xc0   : > { %v797_v21 = vpop.f32.mrf.mxu2  ;;  %v741_v23 = vpop.f32.mrf.mxu0 }
  0xc1   : > { %v798_v22 = vadd.f32 %v797_v21, %v769_v19  ;;  %v770_v24 = vpop.f32.mrf.mxu1  ;;  %v826_v50 = vpop.f32.mrf.mxu3  ;;  %v742_v61 = vadd.f32 %v1619_v6, %v741_v23 }
  0xc3   : > { %v771_v4 = vadd.f32 %v770_v24, %v742_v61  ;;  %v827_v10 = vadd.f32 %v826_v50, %v798_v22 }
  0xc8   : > { %v799_v25 = vpop.f32.mrf.mxu2  ;;  %v744_v26 = vpop.f32.mrf.mxu0 }
  0xc9   : > { %v773_v27 = vpop.f32.mrf.mxu1  ;;  %v745_v28 = vadd.f32 %v1619_v6, %v744_v26  ;;  %v828_v60 = vpop.f32.mrf.mxu3  ;;  %v800_v8 = vadd.f32 %v799_v25, %v771_v4 }
  0xcb   : > { %v774_v29 = vadd.f32 %v773_v27, %v745_v28  ;;  %v829_v13 = vadd.f32 %v828_v60, %v800_v8 }
  0xd0   : > { %v802_v30 = vpop.f32.mrf.mxu2  ;;  %v746_v32 = vpop.f32.mrf.mxu0 }
  0xd1   : > { %v1627_v31 = vadd.f32 %v802_v30, %v774_v29  ;;  %v775_v33 = vpop.f32.mrf.mxu1  ;;  %v831_v11 = vpop.f32.mrf.mxu3  ;;  %v747_v19 = vadd.f32 %v1619_v6, %v746_v32 }
  0xd3   : > { %v776_v22 = vadd.f32 %v775_v33, %v747_v19 }
  0xd8   : > { %v804_v35 = vpop.f32.mrf.mxu2  ;;  %v749_v36 = vpop.f32.mrf.mxu0 }
  0xd9   : > { %v778_v37 = vpop.f32.mrf.mxu1  ;;  %v750_v38 = vadd.f32 %v1619_v6, %v749_v36  ;;  %v833_v27 = vpop.f32.mrf.mxu3  ;;  %v805_v30 = vadd.f32 %v804_v35, %v776_v22  ;;  %v832_v36 = vadd.f32 %v831_v11, %v1627_v31 }
  0xdb   : > { %v779_v39 = vadd.f32 %v778_v37, %v750_v38  ;;  %v834_v38 = vadd.f32 %v833_v27, %v805_v30 }
  0xe0   : > { %v807_v40 = vpop.f32.mrf.mxu2  ;;  %v1632_v42 = vpop.f32.mrf.mxu0 }
  0xe1   : > { %v1630_v41 = vadd.f32 %v807_v40, %v779_v39  ;;  %v1634_v43 = vpop.f32.mrf.mxu1  ;;  %v836_v45 = vpop.f32.mrf.mxu3 }
  0xe8   : > { %v1637_v46 = vpop.f32.mrf.mxu2  ;;  %v850_v47 = vpop.f32.mrf.mxu0 }
  0xe9   : > { %v879_v48 = vpop.f32.mrf.mxu1  ;;  %v851_v55 = vadd.f32 %v850_v47, %v822_v52 }
  0xeb   : > { %v880_v59 = vadd.f32 %v879_v48, %v851_v55  ;;  %v752_v48 = vadd.f32 %v1619_v6, %v1632_v42 }
  0xed   : > { %v781_v31 = vadd.f32 %v1634_v43, %v752_v48 }
  0xef   : > { %v810_v55 = vadd.f32 %v1637_v46, %v781_v31 }
  0xf0   : > { %v908_v53 = vpop.f32.mrf.mxu2  ;;  %v852_v56 = vpop.f32.mrf.mxu0 }
  0xf1   : > { %v881_v57 = vpop.f32.mrf.mxu1  ;;  %v853_v58 = vadd.f32 %v852_v56, %v824_v54  ;;  %v909_v62 = vadd.f32 %v908_v53, %v880_v59 }
  0xf3   : > { %v882_v63 = vadd.f32 %v881_v57, %v853_v58  ;;  %v928_v5 = vmax.f32 %v909_v62, 0.0  ;;  %v838_v57 = vpop.f32.mrf.mxu3  ;;  %v837_v58 = vadd.f32 %v836_v45, %v1630_v41  ;;  %v1351_v41 = vld [vmem:[%s1673_s4] ss:$0 sm:$0xff] }
  0xf4   : > { %v839_v42 = vadd.f32 %v838_v57, %v810_v55 }
  0xf8   : > { %v910_v0 = vpop.f32.mrf.mxu2  ;;  %v855_v2 = vpop.f32.mrf.mxu0 }
  0xf9   : > { %v911_v1 = vadd.f32 %v910_v0, %v882_v63  ;;  %v884_v3 = vpop.f32.mrf.mxu1  ;;  %v856_v14 = vadd.f32 %v855_v2, %v827_v10 }
  0xfb   : > { %v929_v7 = vmax.f32 %v911_v1, 0.0  ;;  %v885_v18 = vadd.f32 %v884_v3, %v856_v14 }
  0xfd   : > { %v936_v9 = vpack.c.bf16 %v929_v7, %v928_v5 }
  0xff   : > { %1284 = vmatmul.msk.bf16.vlgmr.msrb.gmra.mxu3 %vm960_vm1, %v936_v9 }
 0x100   : > { %v913_v12 = vpop.f32.mrf.mxu2  ;;  %v857_v15 = vpop.f32.mrf.mxu0 }
 0x101   : > { %v886_v16 = vpop.f32.mrf.mxu1  ;;  %v858_v17 = vadd.f32 %v857_v15, %v829_v13  ;;  %v914_v20 = vadd.f32 %v913_v12, %v885_v18 }
 0x103   : > { %v887_v21 = vadd.f32 %v886_v16, %v858_v17  ;;  %v930_v28 = vmax.f32 %v914_v20, 0.0 }
 0x108   : > { %v915_v23 = vpop.f32.mrf.mxu2  ;;  %v860_v26 = vpop.f32.mrf.mxu0 }
 0x109   : > { %v916_v24 = vadd.f32 %v915_v23, %v887_v21  ;;  %v889_v25 = vpop.f32.mrf.mxu1  ;;  %v861_v39 = vadd.f32 %v860_v26, %v832_v36 }
 0x10b   : > { %v931_v29 = vmax.f32 %v916_v24, 0.0  ;;  %v890_v47 = vadd.f32 %v889_v25, %v861_v39 }
 0x10d   : > { %v937_v34 = vpack.c.bf16 %v931_v29, %v930_v28 }
 0x10f   : > { %1285 = vmatmul.msk.bf16.gmra.mxu3 %vm960_vm1, %v937_v34 }
 0x110   : > { %v918_v37 = vpop.f32.mrf.mxu2  ;;  %v862_v32 = vpop.f32.mrf.mxu0 }
 0x111   : > { %v891_v40 = vpop.f32.mrf.mxu1  ;;  %v863_v44 = vadd.f32 %v862_v32, %v834_v38  ;;  %v919_v33 = vadd.f32 %v918_v37, %v890_v47 }
 0x113   : > { %v892_v49 = vadd.f32 %v891_v40, %v863_v44  ;;  %v932_v52 = vmax.f32 %v919_v33, 0.0 }
 0x118   : > { %v920_v50 = vpop.f32.mrf.mxu2  ;;  %v865_v51 = vpop.f32.mrf.mxu0 }
 0x119   : > { %v921_v35 = vadd.f32 %v920_v50, %v892_v49  ;;  %v894_v54 = vpop.f32.mrf.mxu1  ;;  %v866_v59 = vadd.f32 %v865_v51, %v837_v58 }
 0x11b   : > { %v933_v53 = vmax.f32 %v921_v35, 0.0  ;;  %v895_v62 = vadd.f32 %v894_v54, %v866_v59 }
 0x11d   : > { %v938_v56 = vpack.c.bf16 %v933_v53, %v932_v52 }
 0x11f   : > { %1286 = vmatmul.msk.bf16.gmra.mxu3 %vm960_vm1, %v938_v56 }
 0x120   : > { %v923_v6 = vpop.f32.mrf.mxu2  ;;  %v867_v60 = vpop.f32.mrf.mxu0 }
 0x121   : > { %v868_v61 = vadd.f32 %v867_v60, %v839_v42  ;;  %v896_v63 = vpop.f32.mrf.mxu1  ;;  %v924_v43 = vadd.f32 %v923_v6, %v895_v62 }
 0x123   : > { %v897_v0 = vadd.f32 %v896_v63, %v868_v61  ;;  %v934_v3 = vmax.f32 %v924_v43, 0.0 }
 0x128   : > { %v925_v1 = vpop.f32.mrf.mxu2 }
 0x129   : > { %v926_v2 = vadd.f32 %v925_v1, %v897_v0 }
 0x12b   : > { %v935_v46 = vmax.f32 %v926_v2, 0.0 }
 0x12d   : > { %v939_v4 = vpack.c.bf16 %v935_v46, %v934_v3 }
 0x12f   : > { %1287 = vmatmul.msk.bf16.gmra.mxu3 %vm960_vm1, %v939_v4 }
 0x182   : > { %v982_v5 = vpop.f32.mrf.mxu3 }
 0x183   : > { %v983_v7 = vadd.f32 %v1351_v41, %v982_v5 }
 0x185   : > { %1003 = vst.msk [vmem:[%s229_s17] sm:$0xff] %vm1002_vm2, %v983_v7 }
 0x18a   : > { %v984_v8 = vpop.f32.mrf.mxu3 }
 0x18b   : > { %v985_v9 = vadd.f32 %v1351_v41, %v984_v8 }
 0x18d   : > { %1004 = vst.msk [vmem:[%s229_s17 + $0x8] sm:$0xff] %vm1002_vm2, %v985_v9 }
 0x192   : > { %v987_v10 = vpop.f32.mrf.mxu3 }
 0x193   : > { %v988_v11 = vadd.f32 %v1351_v41, %v987_v10 }
 0x195   : > { %1005 = vst.msk [vmem:[%s229_s17 + $0x10] sm:$0xff] %vm1002_vm2, %v988_v11 }
 0x19a   : > { %v989_v12 = vpop.f32.mrf.mxu3 }
 0x19b   : > { %v990_v13 = vadd.f32 %v1351_v41, %v989_v12 }
 0x19d   : > { %1006 = vst.msk [vmem:[%s229_s17 + $0x18] sm:$0xff] %vm1002_vm2, %v990_v13 }
 0x1a2   : > { %v992_v14 = vpop.f32.mrf.mxu3 }
 0x1a3   : > { %v993_v15 = vadd.f32 %v1351_v41, %v992_v14 }
 0x1a5   : > { %1007 = vst.msk [vmem:[%s229_s17 + $0x20] sm:$0xff] %vm1002_vm2, %v993_v15 }
 0x1aa   : > { %v994_v16 = vpop.f32.mrf.mxu3 }
 0x1ab   : > { %v995_v17 = vadd.f32 %v1351_v41, %v994_v16 }
 0x1ad   : > { %1008 = vst.msk [vmem:[%s229_s17 + $0x28] sm:$0xff] %vm1002_vm2, %v995_v17 }
 0x1b2   : > { %v997_v18 = vpop.f32.mrf.mxu3 }
 0x1b3   : > { %v998_v19 = vadd.f32 %v1351_v41, %v997_v18 }
 0x1b5   : > { %1009 = vst.msk [vmem:[%s229_s17 + $0x30] sm:$0xff] %vm1002_vm2, %v998_v19 }
 0x1ba   : > { %v999_v20 = vpop.f32.mrf.mxu3 }
 0x1bb   : > { %v1000_v21 = vadd.f32 %v1351_v41, %v999_v20 }
 0x1bd   : > { %1010 = vst.msk [vmem:[%s229_s17 + $0x38] sm:$0xff] %vm1002_vm2, %v1000_v21 }
 0x1be PF: > { %s15_s18 = sadd.s32 1, %s1358_s18  }
 0x1bf   : > { %p12_p4 = scmp.ge.s32.totalorder %s15_s18, 6  }
 0x1c1   :  { %14 = sbr.rel (!%p12_p4) target bundleno = 1 (0x1), region = 70 }

</bundles_post_ra>
